<compile_context>
chip_gen: v7x
topology: tpu7x:2x2x1
jax: 0.10.0
libtpu: 0.0.40
codegen_flags: <defaults>
</compile_context>

<pallas_src>
import functools

import jax
import jax.numpy as jnp
import numpy as np
from jax.experimental import pallas as pl
from jax.experimental.pallas import tpu as pltpu


def _elu(x):
    # ELU(alpha=1): x if x > 0 else exp(x) - 1
    return jnp.where(x > 0, x, jnp.exp(jnp.minimum(x, 0.0)) - 1.0)


def _ceil8(x):
    return ((x + 7) // 8) * 8


# -----------------------------------------------------------------------------
# Kernel
# -----------------------------------------------------------------------------
def attentive_posterior_c_kernel(hz_ref, c_ref, wb_ref, out_ref, *,
                                 bs, ns, hid_dim, c_dim, z_dim, n_head, offs):
    f32 = jnp.float32
    N = bs * ns
    H = hid_dim
    hd = H // n_head
    o = offs

    # ---- unpack the single packed parameter block (static, sublane-aligned slices) ----
    w_hz = wb_ref[o["whz"]:o["whz"] + H + z_dim, :H]          # [Wh ; Wz]  (hid+z, hid)
    w_c = wb_ref[o["wc"]:o["wc"] + c_dim, :H]                 # Wc         (c,     hid)
    w_qkv = wb_ref[o["wqkv"]:o["wqkv"] + H, :3 * H]           # [Wq|Wk|Wv] (hid, 3*hid)
    w_1 = wb_ref[o["w1"]:o["w1"] + H, :H]                     # PostPool linear 1
    w_2 = wb_ref[o["w2"]:o["w2"] + H, :H]                     # PostPool linear 2
    w_p = wb_ref[o["wp"]:o["wp"] + H, :2 * c_dim]             # PostPool linear_params
    ob = o["bias"]
    b_e = wb_ref[ob + 0:ob + 1, :H]                           # bh + bz + bc (folded)
    b_qkv = wb_ref[ob + 1:ob + 2, :3 * H]                     # [bq|bk|bv]
    b_1 = wb_ref[ob + 2:ob + 3, :H]
    b_2 = wb_ref[ob + 3:ob + 4, :H]
    b_p = wb_ref[ob + 4:ob + 5, :2 * c_dim]
    bn_g = wb_ref[ob + 5:ob + 6, 0:1]                         # (1,1) BN affine gamma
    bn_b = wb_ref[ob + 5:ob + 6, 1:2]                         # (1,1) BN affine beta

    # ---- front end: e = linear_h(h) + linear_z(z) + linear_c(c).expand_as(...) ----
    # One fused matmul for h|z; linear_c runs on only bs rows and is broadcast in-kernel.
    ehz = jnp.dot(hz_ref[...], w_hz, preferred_element_type=f32)        # (N, hid)
    ec = jnp.dot(c_ref[...], w_c, preferred_element_type=f32) + b_e     # (bs, hid)
    e3 = ehz.reshape(bs, ns, H) + ec[:, None, :]                        # (bs, ns, hid)
    e = e3.reshape(N, H)

    # ---- TBlock: fused q/k/v projection; query = mean over samples after the linear map ----
    proj = jnp.dot(e, w_qkv, preferred_element_type=f32) + b_qkv        # (N, 3*hid)
    proj3 = proj.reshape(bs, ns, 3 * H)
    q = jnp.mean(proj3[:, :, 0:H], axis=1)        # (bs, hid) == Wq @ e.mean(1) + bq
    k = proj3[:, :, H:2 * H]                      # (bs, ns, hid)
    v = proj3[:, :, 2 * H:3 * H]                  # (bs, ns, hid)

    scale = 1.0 / (hd ** 0.5)
    outs, atts = [], []
    for hh in range(n_head):                      # static loop, n_head is compile-time
        lo, hi = hh * hd, (hh + 1) * hd
        qh = q[:, lo:hi]                          # (bs, hd)
        kh = k[:, :, lo:hi]                       # (bs, ns, hd)
        vh = v[:, :, lo:hi]                       # (bs, ns, hd)
        sim = jnp.sum(qh[:, None, :] * kh, axis=-1) * scale             # (bs, ns)
        sim = sim - jnp.max(sim, axis=-1, keepdims=True)                # stable softmax
        ew = jnp.exp(sim)
        attw = ew / jnp.sum(ew, axis=-1, keepdims=True)                 # (bs, ns)
        outs.append(jnp.sum(attw[:, :, None] * vh, axis=1))             # (bs, hd)
        atts.append(attw)
    a = jnp.concatenate(outs, axis=-1)            # (bs, hid)  head-major channel order
    att = jnp.concatenate(atts, axis=-1)          # (bs, n_head*ns)  lane-dense

    # ---- PostPool: 2x(Linear+ELU), linear_params, BatchNorm1d(1, eps=1e-3) training mode ----
    t = _elu(jnp.dot(a, w_1, preferred_element_type=f32) + b_1)
    t = _elu(jnp.dot(t, w_2, preferred_element_type=f32) + b_2)
    p = jnp.dot(t, w_p, preferred_element_type=f32) + b_p               # (bs, 2*c_dim)
    mu = jnp.mean(p)
    var = jnp.mean((p - mu) ** 2)
    p = (p - mu) * (bn_g * jax.lax.rsqrt(var + 1e-3)) + bn_b            # affine folded in scale

    # ---- single lane-dense output slab: [a | att | mean|logvar] ----
    out_ref[...] = jnp.concatenate([a, att, p], axis=-1)


# -----------------------------------------------------------------------------
# Wrapper (glue) + packing
# -----------------------------------------------------------------------------
def _full_spec(shape):
    # whole-array block, single grid step
    return pl.BlockSpec(shape, lambda i: (0,) * len(shape))


def attentive_posterior_c(h, z, c, wb, *, offs, bs, ns, hid_dim, c_dim, z_dim, n_head=4):
    """Forward pass.  `wb`/`offs` come from pack_params (packed once, host-side)."""
    N = bs * ns
    h2 = h.reshape(N, hid_dim).astype(jnp.float32)
    # TODO(synk): the `z is None` branch of forward (ez = zeros, NOT linear_z(0)) and the
    # ladder=True (feats) branch are host-side control flow and are not folded into the kernel.
    z2 = z.reshape(N, z_dim).astype(jnp.float32)
    hz = jnp.concatenate([h2, z2], axis=-1)            # (N, hid+z): fused matmul operand
    c2 = c.reshape(-1, c_dim).astype(jnp.float32)      # (bs, c): no repeat over ns

    out_w = hid_dim + n_head * ns + 2 * c_dim
    kernel = functools.partial(
        attentive_posterior_c_kernel,
        bs=bs, ns=ns, hid_dim=hid_dim, c_dim=c_dim, z_dim=z_dim, n_head=n_head, offs=offs)

    out = pl.pallas_call(
        kernel,
        grid=(1,),
        in_specs=[_full_spec(hz.shape), _full_spec(c2.shape), _full_spec(wb.shape)],
        out_specs=_full_spec((bs, out_w)),
        out_shape=jax.ShapeDtypeStruct((bs, out_w), jnp.float32),
        compiler_params=pltpu.CompilerParams(dimension_semantics=("arbitrary",)),
    )(hz, c2, wb)

    # host-side static slices / reshapes (free)
    a = out[:, :hid_dim]
    att = out[:, hid_dim:hid_dim + n_head * ns].reshape(bs, n_head, 1, ns)
    mean = out[:, hid_dim + n_head * ns: hid_dim + n_head * ns + c_dim]
    logvar = out[:, hid_dim + n_head * ns + c_dim:]
    return mean, logvar, a, att, None


def pack_params(params, *, hid_dim, c_dim, z_dim):
    """Pack every weight/bias into ONE lane-padded f32 array (done once, host-side)."""
    (wh, bh, wz, bz, wc, bc, wq, bq, wk, bk, wv, bv,
     w1, b1, w2, b2, wp, bp, bn_g, bn_b) = [np.asarray(p, np.float32) for p in params]
    H = hid_dim
    w_hz = np.concatenate([wh, wz], axis=0)                  # (hid+z, hid)
    w_qkv = np.concatenate([wq, wk, wv], axis=1)             # (hid, 3*hid)
    sections = [("whz", w_hz), ("wc", wc), ("wqkv", w_qkv),
                ("w1", w1), ("w2", w2), ("wp", wp)]
    lanes = max(3 * H, 2 * c_dim, H)
    offs, rows = {}, 0
    for name, arr in sections:
        offs[name] = rows
        rows += _ceil8(arr.shape[0])
    offs["bias"] = rows
    rows += 8
    wb = np.zeros((rows, lanes), np.float32)
    for name, arr in sections:
        r, w = arr.shape
        wb[offs[name]:offs[name] + r, :w] = arr
    ob = offs["bias"]
    wb[ob + 0, :H] = bh + bz + bc                            # folded front-end bias
    wb[ob + 1, :3 * H] = np.concatenate([bq, bk, bv])
    wb[ob + 2, :H] = b1
    wb[ob + 3, :H] = b2
    wb[ob + 4, :2 * c_dim] = bp
    wb[ob + 5, 0] = bn_g
    wb[ob + 5, 1] = bn_b
    return jnp.asarray(wb), offs


def init_params(key, *, hid_dim, c_dim, z_dim):
    """Deterministic PyTorch-style (uniform +/- 1/sqrt(fan_in)) initialization."""
    def lin(k, fan_in, fan_out):
        k1, k2 = jax.random.split(k)
        bound = 1.0 / float(np.sqrt(fan_in))
        w = jax.random.uniform(k1, (fan_in, fan_out), jnp.float32, -bound, bound)
        b = jax.random.uniform(k2, (fan_out,), jnp.float32, -bound, bound)
        return w, b

    ks = jax.random.split(key, 9)
    wh, bh = lin(ks[0], hid_dim, hid_dim)      # linear_h
    wz, bz = lin(ks[1], z_dim, hid_dim)        # linear_z
    wc, bc = lin(ks[2], c_dim, hid_dim)        # linear_c
    wq, bq = lin(ks[3], hid_dim, hid_dim)      # TBlock.query
    wk, bk = lin(ks[4], hid_dim, hid_dim)      # TBlock.key
    wv, bv = lin(ks[5], hid_dim, hid_dim)      # TBlock.value
    w1, b1 = lin(ks[6], hid_dim, hid_dim)      # PostPool linear 1
    w2, b2 = lin(ks[7], hid_dim, hid_dim)      # PostPool linear 2
    wp, bp = lin(ks[8], hid_dim, 2 * c_dim)    # PostPool linear_params
    bn_g = jnp.float32(1.0)                    # BatchNorm1d(1) affine (default init)
    bn_b = jnp.float32(0.0)
    return (wh, bh, wz, bz, wc, bc, wq, bq, wk, bk, wv, bv,
            w1, b1, w2, b2, wp, bp, bn_g, bn_b)


# -----------------------------------------------------------------------------
# Pure-JAX reference mirroring the PyTorch forward (for verification)
# -----------------------------------------------------------------------------
def reference_forward(h, z, c, bs, ns, params, *, hid_dim, c_dim, z_dim, n_head):
    (wh, bh, wz, bz, wc, bc, wq, bq, wk, bk, wv, bv,
     w1, b1, w2, b2, wp, bp, bn_g, bn_b) = params
    N = bs * ns
    hd = hid_dim // n_head
    eh = (h.reshape(N, hid_dim) @ wh + bh).reshape(bs, ns, hid_dim)
    ez = (z.reshape(N, z_dim) @ wz + bz).reshape(bs, ns, hid_dim)
    ec = (c.reshape(-1, c_dim) @ wc + bc).reshape(bs, 1, hid_dim)
    e = eh + ez + ec                                        # expand_as broadcast
    zq = e.mean(axis=1)                                     # (bs, hid)
    q = (zq @ wq + bq).reshape(bs, 1, n_head, hd).transpose(0, 2, 1, 3)
    k = (e.reshape(N, hid_dim) @ wk + bk).reshape(bs, ns, n_head, hd).transpose(0, 2, 1, 3)
    v = (e.reshape(N, hid_dim) @ wv + bv).reshape(bs, ns, n_head, hd).transpose(0, 2, 1, 3)
    sim = (q @ jnp.swapaxes(k, -1, -2)) * (1.0 / np.sqrt(hd))
    att = jax.nn.softmax(sim, axis=-1)                      # (bs, nh, 1, ns)
    a = (att @ v).transpose(0, 2, 1, 3).reshape(bs, hid_dim)
    t = _elu(a @ w1 + b1)
    t = _elu(t @ w2 + b2)
    p = t @ wp + bp
    mu = p.mean()
    var = ((p - mu) ** 2).mean()
    p = (p - mu) / jnp.sqrt(var + 1e-3) * bn_g + bn_b       # BatchNorm1d(1), training mode
    return p[:, :c_dim], p[:, c_dim:], a, att


if __name__ == "__main__":
    # Small, forward-consistent shapes (hid_dim divisible by n_head=4).
    num_layers, hid_dim, c_dim, z_dim, h_dim, n_head = 3, 32, 24, 16, 32, 4  # num_layers/h_dim unused in forward
    bs, ns = 2, 8

    key = jax.random.PRNGKey(0)
    kh, kz, kc, kp = jax.random.split(key, 4)
    h = jax.random.normal(kh, (bs, ns, hid_dim), jnp.float32)   # data embedding at layer l
    z = jax.random.normal(kz, (bs, ns, z_dim), jnp.float32)     # latent samples at layer l+1
    c = jax.random.normal(kc, (bs, 1, c_dim), jnp.float32)      # context summary at layer l+1

    params = init_params(kp, hid_dim=hid_dim, c_dim=c_dim, z_dim=z_dim)
    wb, offs = pack_params(params, hid_dim=hid_dim, c_dim=c_dim, z_dim=z_dim)  # packed ONCE

    fwd = jax.jit(functools.partial(
        attentive_posterior_c, offs=offs, bs=bs, ns=ns,
        hid_dim=hid_dim, c_dim=c_dim, z_dim=z_dim, n_head=n_head))

    mean, logvar, a, att, _ = fwd(h, z, c, wb)
    jax.block_until_ready((mean, logvar, a, att))

    mean_r, logvar_r, a_r, att_r = reference_forward(
        h, z, c, bs, ns, params,
        hid_dim=hid_dim, c_dim=c_dim, z_dim=z_dim, n_head=n_head)

    assert mean.shape == (bs, c_dim) and logvar.shape == (bs, c_dim)
    assert a.shape == (bs, hid_dim) and att.shape == (bs, n_head, 1, ns)
    assert jnp.allclose(mean, mean_r, atol=2e-3, rtol=2e-3)
    assert jnp.allclose(logvar, logvar_r, atol=2e-3, rtol=2e-3)
    assert jnp.allclose(a, a_r, atol=2e-3, rtol=2e-3)
    assert jnp.allclose(att, att_r, atol=2e-3, rtol=2e-3)

    print("KERNEL_OK")
</pallas_src>

<mosaic_0001>
module attributes {stable_mosaic.version = 11 : i64} {
  func.func @attentive_posterior_c_kernel(%arg0: i32, %arg1: memref<16x48xf32, #tpu.memory_space<vmem>>, %arg2: memref<2x24xf32, #tpu.memory_space<vmem>>, %arg3: memref<208x96xf32, #tpu.memory_space<vmem>>, %arg4: memref<2x112xf32, #tpu.memory_space<vmem>>) attributes {dimension_semantics = [#tpu.dimension_semantics<arbitrary>], iteration_bounds = array<i64: 1>, scalar_prefetch = 0 : i64, scratch_operands = 0 : i64, tpu.core_type = #tpu.core_type<tc>, window_params = [{pipeline_mode = #tpu.pipeline_mode<synchronous>, transform_indices = @transform_0, window_bounds = array<i64: 16, 48>}, {pipeline_mode = #tpu.pipeline_mode<synchronous>, transform_indices = @transform_1, window_bounds = array<i64: 2, 24>}, {pipeline_mode = #tpu.pipeline_mode<synchronous>, transform_indices = @transform_2, window_bounds = array<i64: 208, 96>}, {pipeline_mode = #tpu.pipeline_mode<synchronous>, transform_indices = @transform_3, window_bounds = array<i64: 2, 112>}]} {
    %c0 = arith.constant 0 : index
    %c0_0 = arith.constant 0 : index
    %0 = vector.load %arg3[%c0, %c0_0] : memref<208x96xf32, #tpu.memory_space<vmem>>, vector<48x32xf32>
    %c48 = arith.constant 48 : index
    %c0_1 = arith.constant 0 : index
    %1 = vector.load %arg3[%c48, %c0_1] : memref<208x96xf32, #tpu.memory_space<vmem>>, vector<24x32xf32>
    %c72 = arith.constant 72 : index
    %c0_2 = arith.constant 0 : index
    %2 = vector.load %arg3[%c72, %c0_2] : memref<208x96xf32, #tpu.memory_space<vmem>>, vector<32x96xf32>
    %c104 = arith.constant 104 : index
    %c0_3 = arith.constant 0 : index
    %3 = vector.load %arg3[%c104, %c0_3] : memref<208x96xf32, #tpu.memory_space<vmem>>, vector<32x32xf32>
    %c136 = arith.constant 136 : index
    %c0_4 = arith.constant 0 : index
    %4 = vector.load %arg3[%c136, %c0_4] : memref<208x96xf32, #tpu.memory_space<vmem>>, vector<32x32xf32>
    %c168 = arith.constant 168 : index
    %c0_5 = arith.constant 0 : index
    %5 = vector.load %arg3[%c168, %c0_5] : memref<208x96xf32, #tpu.memory_space<vmem>>, vector<32x48xf32>
    %c200 = arith.constant 200 : index
    %c0_6 = arith.constant 0 : index
    %6 = vector.load %arg3[%c200, %c0_6] : memref<208x96xf32, #tpu.memory_space<vmem>>, vector<1x32xf32>
    %c201 = arith.constant 201 : index
    %c0_7 = arith.constant 0 : index
    %7 = vector.load %arg3[%c201, %c0_7] : memref<208x96xf32, #tpu.memory_space<vmem>>, vector<1x96xf32>
    %c202 = arith.constant 202 : index
    %c0_8 = arith.constant 0 : index
    %8 = vector.load %arg3[%c202, %c0_8] : memref<208x96xf32, #tpu.memory_space<vmem>>, vector<1x32xf32>
    %c203 = arith.constant 203 : index
    %c0_9 = arith.constant 0 : index
    %9 = vector.load %arg3[%c203, %c0_9] : memref<208x96xf32, #tpu.memory_space<vmem>>, vector<1x32xf32>
    %c204 = arith.constant 204 : index
    %c0_10 = arith.constant 0 : index
    %10 = vector.load %arg3[%c204, %c0_10] : memref<208x96xf32, #tpu.memory_space<vmem>>, vector<1x48xf32>
    %c205 = arith.constant 205 : index
    %c0_11 = arith.constant 0 : index
    %11 = vector.load %arg3[%c205, %c0_11] : memref<208x96xf32, #tpu.memory_space<vmem>>, vector<1x1xf32>
    %c205_12 = arith.constant 205 : index
    %c1 = arith.constant 1 : index
    %12 = vector.load %arg3[%c205_12, %c1] : memref<208x96xf32, #tpu.memory_space<vmem>>, vector<1x1xf32>
    %c0_13 = arith.constant 0 : index
    %c0_14 = arith.constant 0 : index
    %13 = vector.load %arg1[%c0_13, %c0_14] : memref<16x48xf32, #tpu.memory_space<vmem>>, vector<16x48xf32>
    %cst = arith.constant dense<0.000000e+00> : vector<16x32xf32>
    %14 = tpu.matmul %13, %0, %cst {dimension_numbers = #tpu.dot_dimension_numbers<[1], [0], [0], [1], [0, 0, 1, 1], [], []>} : vector<16x48xf32>, vector<48x32xf32>, vector<16x32xf32> -> vector<16x32xf32>
    %c0_15 = arith.constant 0 : index
    %c0_16 = arith.constant 0 : index
    %15 = vector.load %arg2[%c0_15, %c0_16] : memref<2x24xf32, #tpu.memory_space<vmem>>, vector<2x24xf32>
    %cst_17 = arith.constant dense<0.000000e+00> : vector<2x32xf32>
    %16 = tpu.matmul %15, %1, %cst_17 {dimension_numbers = #tpu.dot_dimension_numbers<[1], [0], [0], [1], [0, 0, 1, 1], [], []>} : vector<2x24xf32>, vector<24x32xf32>, vector<2x32xf32> -> vector<2x32xf32>
    %17 = vector.broadcast %6 : vector<1x32xf32> to vector<2x32xf32>
    %18 = arith.addf %16, %17 : vector<2x32xf32>
    %19 = vector.shape_cast %14 : vector<16x32xf32> to vector<2x8x32xf32>
    %20 = vector.shape_cast %18 : vector<2x32xf32> to vector<2x1x32xf32>
    %21 = vector.broadcast %20 : vector<2x1x32xf32> to vector<2x8x32xf32>
    %22 = arith.addf %19, %21 : vector<2x8x32xf32>
    %23 = vector.shape_cast %22 : vector<2x8x32xf32> to vector<16x32xf32>
    %cst_18 = arith.constant dense<0.000000e+00> : vector<16x96xf32>
    %24 = tpu.matmul %23, %2, %cst_18 {dimension_numbers = #tpu.dot_dimension_numbers<[1], [0], [0], [1], [0, 0, 1, 1], [], []>} : vector<16x32xf32>, vector<32x96xf32>, vector<16x96xf32> -> vector<16x96xf32>
    %25 = vector.broadcast %7 : vector<1x96xf32> to vector<16x96xf32>
    %26 = arith.addf %24, %25 : vector<16x96xf32>
    %27 = vector.shape_cast %26 : vector<16x96xf32> to vector<2x8x96xf32>
    %28 = vector.extract_strided_slice %27 {offsets = [0, 0, 0], sizes = [2, 8, 32], strides = [1, 1, 1]} : vector<2x8x96xf32> to vector<2x8x32xf32>
    %cst_19 = arith.constant dense<0.000000e+00> : vector<2x32xf32>
    %29 = vector.multi_reduction <add>, %28, %cst_19 [1] : vector<2x8x32xf32> to vector<2x32xf32>
    %cst_20 = arith.constant 8.000000e+00 : f32
    %30 = vector.broadcast %cst_20 : f32 to vector<2x32xf32>
    %31 = arith.divf %29, %30 : vector<2x32xf32>
    %32 = vector.extract_strided_slice %27 {offsets = [0, 0, 32], sizes = [2, 8, 32], strides = [1, 1, 1]} : vector<2x8x96xf32> to vector<2x8x32xf32>
    %33 = vector.extract_strided_slice %27 {offsets = [0, 0, 64], sizes = [2, 8, 32], strides = [1, 1, 1]} : vector<2x8x96xf32> to vector<2x8x32xf32>
    %34 = vector.extract_strided_slice %31 {offsets = [0, 0], sizes = [2, 8], strides = [1, 1]} : vector<2x32xf32> to vector<2x8xf32>
    %35 = vector.extract_strided_slice %32 {offsets = [0, 0, 0], sizes = [2, 8, 8], strides = [1, 1, 1]} : vector<2x8x32xf32> to vector<2x8x8xf32>
    %36 = vector.extract_strided_slice %33 {offsets = [0, 0, 0], sizes = [2, 8, 8], strides = [1, 1, 1]} : vector<2x8x32xf32> to vector<2x8x8xf32>
    %37 = vector.shape_cast %34 : vector<2x8xf32> to vector<2x1x8xf32>
    %38 = vector.broadcast %37 : vector<2x1x8xf32> to vector<2x8x8xf32>
    %39 = arith.mulf %38, %35 : vector<2x8x8xf32>
    %cst_21 = arith.constant dense<0.000000e+00> : vector<2x8xf32>
    %40 = vector.multi_reduction <add>, %39, %cst_21 [2] : vector<2x8x8xf32> to vector<2x8xf32>
    %cst_22 = arith.constant 0.353553385 : f32
    %41 = vector.broadcast %cst_22 : f32 to vector<2x8xf32>
    %42 = arith.mulf %40, %41 : vector<2x8xf32>
    %cst_23 = arith.constant dense<0xFF800000> : vector<2xf32>
    %43 = vector.multi_reduction <maximumf>, %42, %cst_23 [1] : vector<2x8xf32> to vector<2xf32>
    %44 = vector.shape_cast %43 : vector<2xf32> to vector<2x1xf32>
    %45 = vector.broadcast %44 : vector<2x1xf32> to vector<2x8xf32>
    %46 = arith.subf %42, %45 : vector<2x8xf32>
    %47 = math.exp %46 : vector<2x8xf32>
    %cst_24 = arith.constant dense<0.000000e+00> : vector<2xf32>
    %48 = vector.multi_reduction <add>, %47, %cst_24 [1] : vector<2x8xf32> to vector<2xf32>
    %49 = vector.shape_cast %48 : vector<2xf32> to vector<2x1xf32>
    %50 = vector.broadcast %49 : vector<2x1xf32> to vector<2x8xf32>
    %51 = arith.divf %47, %50 : vector<2x8xf32>
    %52 = vector.shape_cast %51 : vector<2x8xf32> to vector<2x8x1xf32>
    %53 = vector.broadcast %52 : vector<2x8x1xf32> to vector<2x8x8xf32>
    %54 = arith.mulf %53, %36 : vector<2x8x8xf32>
    %cst_25 = arith.constant dense<0.000000e+00> : vector<2x8xf32>
    %55 = vector.multi_reduction <add>, %54, %cst_25 [1] : vector<2x8x8xf32> to vector<2x8xf32>
    %56 = vector.extract_strided_slice %31 {offsets = [0, 8], sizes = [2, 8], strides = [1, 1]} : vector<2x32xf32> to vector<2x8xf32>
    %57 = vector.extract_strided_slice %32 {offsets = [0, 0, 8], sizes = [2, 8, 8], strides = [1, 1, 1]} : vector<2x8x32xf32> to vector<2x8x8xf32>
    %58 = vector.extract_strided_slice %33 {offsets = [0, 0, 8], sizes = [2, 8, 8], strides = [1, 1, 1]} : vector<2x8x32xf32> to vector<2x8x8xf32>
    %59 = vector.shape_cast %56 : vector<2x8xf32> to vector<2x1x8xf32>
    %60 = vector.broadcast %59 : vector<2x1x8xf32> to vector<2x8x8xf32>
    %61 = arith.mulf %60, %57 : vector<2x8x8xf32>
    %cst_26 = arith.constant dense<0.000000e+00> : vector<2x8xf32>
    %62 = vector.multi_reduction <add>, %61, %cst_26 [2] : vector<2x8x8xf32> to vector<2x8xf32>
    %cst_27 = arith.constant 0.353553385 : f32
    %63 = vector.broadcast %cst_27 : f32 to vector<2x8xf32>
    %64 = arith.mulf %62, %63 : vector<2x8xf32>
    %cst_28 = arith.constant dense<0xFF800000> : vector<2xf32>
    %65 = vector.multi_reduction <maximumf>, %64, %cst_28 [1] : vector<2x8xf32> to vector<2xf32>
    %66 = vector.shape_cast %65 : vector<2xf32> to vector<2x1xf32>
    %67 = vector.broadcast %66 : vector<2x1xf32> to vector<2x8xf32>
    %68 = arith.subf %64, %67 : vector<2x8xf32>
    %69 = math.exp %68 : vector<2x8xf32>
    %cst_29 = arith.constant dense<0.000000e+00> : vector<2xf32>
    %70 = vector.multi_reduction <add>, %69, %cst_29 [1] : vector<2x8xf32> to vector<2xf32>
    %71 = vector.shape_cast %70 : vector<2xf32> to vector<2x1xf32>
    %72 = vector.broadcast %71 : vector<2x1xf32> to vector<2x8xf32>
    %73 = arith.divf %69, %72 : vector<2x8xf32>
    %74 = vector.shape_cast %73 : vector<2x8xf32> to vector<2x8x1xf32>
    %75 = vector.broadcast %74 : vector<2x8x1xf32> to vector<2x8x8xf32>
    %76 = arith.mulf %75, %58 : vector<2x8x8xf32>
    %cst_30 = arith.constant dense<0.000000e+00> : vector<2x8xf32>
    %77 = vector.multi_reduction <add>, %76, %cst_30 [1] : vector<2x8x8xf32> to vector<2x8xf32>
    %78 = vector.extract_strided_slice %31 {offsets = [0, 16], sizes = [2, 8], strides = [1, 1]} : vector<2x32xf32> to vector<2x8xf32>
    %79 = vector.extract_strided_slice %32 {offsets = [0, 0, 16], sizes = [2, 8, 8], strides = [1, 1, 1]} : vector<2x8x32xf32> to vector<2x8x8xf32>
    %80 = vector.extract_strided_slice %33 {offsets = [0, 0, 16], sizes = [2, 8, 8], strides = [1, 1, 1]} : vector<2x8x32xf32> to vector<2x8x8xf32>
    %81 = vector.shape_cast %78 : vector<2x8xf32> to vector<2x1x8xf32>
    %82 = vector.broadcast %81 : vector<2x1x8xf32> to vector<2x8x8xf32>
    %83 = arith.mulf %82, %79 : vector<2x8x8xf32>
    %cst_31 = arith.constant dense<0.000000e+00> : vector<2x8xf32>
    %84 = vector.multi_reduction <add>, %83, %cst_31 [2] : vector<2x8x8xf32> to vector<2x8xf32>
    %cst_32 = arith.constant 0.353553385 : f32
    %85 = vector.broadcast %cst_32 : f32 to vector<2x8xf32>
    %86 = arith.mulf %84, %85 : vector<2x8xf32>
    %cst_33 = arith.constant dense<0xFF800000> : vector<2xf32>
    %87 = vector.multi_reduction <maximumf>, %86, %cst_33 [1] : vector<2x8xf32> to vector<2xf32>
    %88 = vector.shape_cast %87 : vector<2xf32> to vector<2x1xf32>
    %89 = vector.broadcast %88 : vector<2x1xf32> to vector<2x8xf32>
    %90 = arith.subf %86, %89 : vector<2x8xf32>
    %91 = math.exp %90 : vector<2x8xf32>
    %cst_34 = arith.constant dense<0.000000e+00> : vector<2xf32>
    %92 = vector.multi_reduction <add>, %91, %cst_34 [1] : vector<2x8xf32> to vector<2xf32>
    %93 = vector.shape_cast %92 : vector<2xf32> to vector<2x1xf32>
    %94 = vector.broadcast %93 : vector<2x1xf32> to vector<2x8xf32>
    %95 = arith.divf %91, %94 : vector<2x8xf32>
    %96 = vector.shape_cast %95 : vector<2x8xf32> to vector<2x8x1xf32>
    %97 = vector.broadcast %96 : vector<2x8x1xf32> to vector<2x8x8xf32>
    %98 = arith.mulf %97, %80 : vector<2x8x8xf32>
    %cst_35 = arith.constant dense<0.000000e+00> : vector<2x8xf32>
    %99 = vector.multi_reduction <add>, %98, %cst_35 [1] : vector<2x8x8xf32> to vector<2x8xf32>
    %100 = vector.extract_strided_slice %31 {offsets = [0, 24], sizes = [2, 8], strides = [1, 1]} : vector<2x32xf32> to vector<2x8xf32>
    %101 = vector.extract_strided_slice %32 {offsets = [0, 0, 24], sizes = [2, 8, 8], strides = [1, 1, 1]} : vector<2x8x32xf32> to vector<2x8x8xf32>
    %102 = vector.extract_strided_slice %33 {offsets = [0, 0, 24], sizes = [2, 8, 8], strides = [1, 1, 1]} : vector<2x8x32xf32> to vector<2x8x8xf32>
    %103 = vector.shape_cast %100 : vector<2x8xf32> to vector<2x1x8xf32>
    %104 = vector.broadcast %103 : vector<2x1x8xf32> to vector<2x8x8xf32>
    %105 = arith.mulf %104, %101 : vector<2x8x8xf32>
    %cst_36 = arith.constant dense<0.000000e+00> : vector<2x8xf32>
    %106 = vector.multi_reduction <add>, %105, %cst_36 [2] : vector<2x8x8xf32> to vector<2x8xf32>
    %cst_37 = arith.constant 0.353553385 : f32
    %107 = vector.broadcast %cst_37 : f32 to vector<2x8xf32>
    %108 = arith.mulf %106, %107 : vector<2x8xf32>
    %cst_38 = arith.constant dense<0xFF800000> : vector<2xf32>
    %109 = vector.multi_reduction <maximumf>, %108, %cst_38 [1] : vector<2x8xf32> to vector<2xf32>
    %110 = vector.shape_cast %109 : vector<2xf32> to vector<2x1xf32>
    %111 = vector.broadcast %110 : vector<2x1xf32> to vector<2x8xf32>
    %112 = arith.subf %108, %111 : vector<2x8xf32>
    %113 = math.exp %112 : vector<2x8xf32>
    %cst_39 = arith.constant dense<0.000000e+00> : vector<2xf32>
    %114 = vector.multi_reduction <add>, %113, %cst_39 [1] : vector<2x8xf32> to vector<2xf32>
    %115 = vector.shape_cast %114 : vector<2xf32> to vector<2x1xf32>
    %116 = vector.broadcast %115 : vector<2x1xf32> to vector<2x8xf32>
    %117 = arith.divf %113, %116 : vector<2x8xf32>
    %118 = vector.shape_cast %117 : vector<2x8xf32> to vector<2x8x1xf32>
    %119 = vector.broadcast %118 : vector<2x8x1xf32> to vector<2x8x8xf32>
    %120 = arith.mulf %119, %102 : vector<2x8x8xf32>
    %cst_40 = arith.constant dense<0.000000e+00> : vector<2x8xf32>
    %121 = vector.multi_reduction <add>, %120, %cst_40 [1] : vector<2x8x8xf32> to vector<2x8xf32>
    %122 = tpu.concatenate %55, %77, %99, %121 in 1 : vector<2x8xf32>, vector<2x8xf32>, vector<2x8xf32>, vector<2x8xf32> -> vector<2x32xf32>
    %123 = tpu.concatenate %51, %73, %95, %117 in 1 : vector<2x8xf32>, vector<2x8xf32>, vector<2x8xf32>, vector<2x8xf32> -> vector<2x32xf32>
    %cst_41 = arith.constant dense<0.000000e+00> : vector<2x32xf32>
    %124 = tpu.matmul %122, %3, %cst_41 {dimension_numbers = #tpu.dot_dimension_numbers<[1], [0], [0], [1], [0, 0, 1, 1], [], []>} : vector<2x32xf32>, vector<32x32xf32>, vector<2x32xf32> -> vector<2x32xf32>
    %125 = vector.broadcast %8 : vector<1x32xf32> to vector<2x32xf32>
    %126 = arith.addf %124, %125 : vector<2x32xf32>
    %cst_42 = arith.constant 0.000000e+00 : f32
    %127 = vector.broadcast %cst_42 : f32 to vector<2x32xf32>
    %128 = arith.cmpf ogt, %126, %127 : vector<2x32xf32>
    %cst_43 = arith.constant 0.000000e+00 : f32
    %129 = vector.broadcast %cst_43 : f32 to vector<2x32xf32>
    %130 = arith.minimumf %126, %129 : vector<2x32xf32>
    %131 = math.exp %130 : vector<2x32xf32>
    %cst_44 = arith.constant 1.000000e+00 : f32
    %132 = vector.broadcast %cst_44 : f32 to vector<2x32xf32>
    %133 = arith.subf %131, %132 : vector<2x32xf32>
    %134 = arith.select %128, %126, %133 : vector<2x32xi1>, vector<2x32xf32>
    %cst_45 = arith.constant dense<0.000000e+00> : vector<2x32xf32>
    %135 = tpu.matmul %134, %4, %cst_45 {dimension_numbers = #tpu.dot_dimension_numbers<[1], [0], [0], [1], [0, 0, 1, 1], [], []>} : vector<2x32xf32>, vector<32x32xf32>, vector<2x32xf32> -> vector<2x32xf32>
    %136 = vector.broadcast %9 : vector<1x32xf32> to vector<2x32xf32>
    %137 = arith.addf %135, %136 : vector<2x32xf32>
    %cst_46 = arith.constant 0.000000e+00 : f32
    %138 = vector.broadcast %cst_46 : f32 to vector<2x32xf32>
    %139 = arith.cmpf ogt, %137, %138 : vector<2x32xf32>
    %cst_47 = arith.constant 0.000000e+00 : f32
    %140 = vector.broadcast %cst_47 : f32 to vector<2x32xf32>
    %141 = arith.minimumf %137, %140 : vector<2x32xf32>
    %142 = math.exp %141 : vector<2x32xf32>
    %cst_48 = arith.constant 1.000000e+00 : f32
    %143 = vector.broadcast %cst_48 : f32 to vector<2x32xf32>
    %144 = arith.subf %142, %143 : vector<2x32xf32>
    %145 = arith.select %139, %137, %144 : vector<2x32xi1>, vector<2x32xf32>
    %cst_49 = arith.constant dense<0.000000e+00> : vector<2x48xf32>
    %146 = tpu.matmul %145, %5, %cst_49 {dimension_numbers = #tpu.dot_dimension_numbers<[1], [0], [0], [1], [0, 0, 1, 1], [], []>} : vector<2x32xf32>, vector<32x48xf32>, vector<2x48xf32> -> vector<2x48xf32>
    %147 = vector.broadcast %10 : vector<1x48xf32> to vector<2x48xf32>
    %148 = arith.addf %146, %147 : vector<2x48xf32>
    %149 = vector.shape_cast %148 : vector<2x48xf32> to vector<1x2x48xf32>
    %cst_50 = arith.constant dense<0.000000e+00> : vector<1xf32>
    %150 = vector.multi_reduction <add>, %149, %cst_50 [1, 2] : vector<1x2x48xf32> to vector<1xf32>
    %151 = vector.shape_cast %150 : vector<1xf32> to vector<1x1x1xf32>
    %152 = vector.extract %151[0, 0, 0] : f32 from vector<1x1x1xf32>
    %cst_51 = arith.constant 9.600000e+01 : f32
    %153 = arith.divf %152, %cst_51 : f32
    %154 = vector.broadcast %153 : f32 to vector<2x48xf32>
    %155 = arith.subf %148, %154 : vector<2x48xf32>
    %156 = arith.mulf %155, %155 : vector<2x48xf32>
    %157 = vector.shape_cast %156 : vector<2x48xf32> to vector<1x2x48xf32>
    %cst_52 = arith.constant dense<0.000000e+00> : vector<1xf32>
    %158 = vector.multi_reduction <add>, %157, %cst_52 [1, 2] : vector<1x2x48xf32> to vector<1xf32>
    %159 = vector.shape_cast %158 : vector<1xf32> to vector<1x1x1xf32>
    %160 = vector.extract %159[0, 0, 0] : f32 from vector<1x1x1xf32>
    %cst_53 = arith.constant 9.600000e+01 : f32
    %161 = arith.divf %160, %cst_53 : f32
    %162 = vector.broadcast %153 : f32 to vector<2x48xf32>
    %163 = arith.subf %148, %162 : vector<2x48xf32>
    %cst_54 = arith.constant 1.000000e-03 : f32
    %164 = arith.addf %161, %cst_54 : f32
    %165 = math.rsqrt %164 : f32
    %166 = vector.broadcast %165 : f32 to vector<1x1xf32>
    %167 = arith.mulf %11, %166 : vector<1x1xf32>
    %168 = vector.broadcast %167 : vector<1x1xf32> to vector<2x48xf32>
    %169 = arith.mulf %163, %168 : vector<2x48xf32>
    %170 = vector.broadcast %12 : vector<1x1xf32> to vector<2x48xf32>
    %171 = arith.addf %169, %170 : vector<2x48xf32>
    %172 = tpu.concatenate %122, %123, %171 in 1 : vector<2x32xf32>, vector<2x32xf32>, vector<2x48xf32> -> vector<2x112xf32>
    %c0_55 = arith.constant 0 : index
    %c0_56 = arith.constant 0 : index
    %173 = vector.load %arg4[%c0_55, %c0_56] : memref<2x112xf32, #tpu.memory_space<vmem>>, vector<2x112xf32>
    tpu.vector_store %arg4[%c0_55, %c0_56], %172 {strides = array<i32>} : memref<2x112xf32, #tpu.memory_space<vmem>>, vector<2x112xf32>,
    return
  }
  func.func @transform_0(%arg0: i32) -> (i32, i32) {
    %c0_i32 = arith.constant 0 : i32
    %c0_i32_0 = arith.constant 0 : i32
    %c0_i32_1 = arith.constant 0 : i32
    return %c0_i32, %c0_i32_0 : i32, i32
  }
  func.func @transform_1(%arg0: i32) -> (i32, i32) {
    %c0_i32 = arith.constant 0 : i32
    %c0_i32_0 = arith.constant 0 : i32
    %c0_i32_1 = arith.constant 0 : i32
    return %c0_i32, %c0_i32_0 : i32, i32
  }
  func.func @transform_2(%arg0: i32) -> (i32, i32) {
    %c0_i32 = arith.constant 0 : i32
    %c0_i32_0 = arith.constant 0 : i32
    %c0_i32_1 = arith.constant 0 : i32
    return %c0_i32, %c0_i32_0 : i32, i32
  }
  func.func @transform_3(%arg0: i32) -> (i32, i32) {
    %c0_i32 = arith.constant 0 : i32
    %c0_i32_0 = arith.constant 0 : i32
    %c0_i32_1 = arith.constant 0 : i32
    return %c0_i32, %c0_i32_0 : i32, i32
  }
}

</mosaic_0001>

<bundles_post_ra>
// kernel: attentive_posterior_c.1
= control target key start
LH: loop header
LB: loop body
LE: loop exit
PB: predicated region body
PF: predicated region fallthrough
CT: control target
= control target key end

     0   :  { %v1394_v0 = vmov 0.0|0.0   ;;  %vm1395_vm0 = vmmov 0   ;;  %v1396_v4 = vmov 0.0   ;;  %vm47_vm1 = vcmask 392192   ;;  %s1398_s19 = smov 96   ;;  %s1399_s20 = smov 112   ;;  %s1719_s2 = inlined_call_operand.vmem [shape: f32[208,96], index: 2, kind: input, shape index: {}]   ;;  %s1720_s0 = inlined_call_operand.vmem [shape: f32[16,48], index: 0, kind: input, shape index: {}]   ;;  %s1721_s1 = inlined_call_operand.vmem [shape: f32[2,24], index: 1, kind: input, shape index: {}]   ;;  %s1722_s3 = inlined_call_operand.vmem [shape: f32[2,112], index: 3, kind: output, shape index: {}]  }
   0x1   :  { %1303 = vmatprep.subr.bf16.mxu1 %v1394_v0  ;;  %v14_v1 = vld [vmem:[%s1719_s2] sm:$0xff]  ;;  %v15_v2 = vld [vmem:[%s1719_s2 + $0x8] sm:$0xff]  ;;  %v20_v3 = vld [vmem:[%s1719_s2 + $0x30] sm:$0xff]  ;;  %1244 = vmatprep.mubr.msk.f32.mxu1 %vm1395_vm0, %v1396_v4  ;;  %vm134_vm2 = vcmask 195584   ;;  %v1397_v24 = vmov 1966171168   ;;  %v212_v26 = vlaneseq }
   0x2   :  { %v1291_v5 = vpack.c.bf16 %v15_v2, %v14_v1  ;;  %v21_v6 = vld [vmem:[%s1719_s2 + $0x38] sm:$0xff]  ;;  %v16_v7 = vld [vmem:[%s1719_s2 + $0x10] sm:$0xff]  ;;  %v18_v11 = vld [vmem:[%s1719_s2 + $0x20] sm:$0xff]  ;;  %v210_v25 = vunpack.c.l.s4 %v1397_v24  ;;  %vm247_vm3 = vcmask 261120   ;;  %s1400_s21 = smov 120   ;;  %s1401_s22 = smov 104  }
   0x3   :  { %v17_v8 = vld [vmem:[%s1719_s2 + $0x18] sm:$0xff]  ;;  %v1304_v9 = vpack.c.bf16 %v21_v6, %v20_v3  ;;  %v19_v12 = vld [vmem:[%s1719_s2 + $0x28] sm:$0xff]  ;;  %v45_v13 = vld [vmem:[%s1720_s0] sm:$0xff]  ;;  %v1486_v28 = vshrl.u32 %v212_v26, 7  ;;  %vm356_vm4 = vcmask 64512   ;;  %vm377_vm5 = vcmask 1041409  }
   0x4   :  { %v1295_v10 = vpack.c.bf16 %v17_v8, %v16_v7  ;;  %1292 = vmatprep.subr.bf16.mxu0 %v1291_v5  ;;  %v22_v14 = vld [vmem:[%s1719_s2 + $0x40] sm:$0xff]  ;;  %v1299_v15 = vpack.c.bf16 %v19_v12, %v18_v11  ;;  %1235 = vmatprep.mubr.msk.f32.mxu0 %vm47_vm1, %v45_v13  ;;  %v46_v17 = vld [vmem:[%s1720_s0 + $0x8] sm:$0xff]  ;;  %v24_v19 = vld [vmem:[%s1719_s2 + $0x50] sm:$0xff]  ;;  %v211_v27 = vunpack.c.0.s8 %v210_v25  ;;  %vm380_vm6 = vcmask 58368   ;;  %s1403_s23 = smov 64   ;;  %s1404_s28 = smov 32  }
   0x5   :  { %1305 = vmatpush3.bf16.msra.mxu1 %v1304_v9  ;;  %1294 = vmatpush3.bf16.msra.mxu0 %v1291_v5  ;;  %v129_v16 = vld [vmem:[%s1721_s1] sm:$0x3]  ;;  %v23_v18 = vld [vmem:[%s1719_s2 + $0x48] sm:$0xff]  ;;  %v25_v21 = vld [vmem:[%s1719_s2 + $0x58] sm:$0xff]  ;;  %v1493_v35 = vsub.s32 0, %v1486_v28  ;;  %vm449_vm7 = vcmask 589312  }
   0x6   :  { %1242 = vmatprep.subr.mxu1 %v1396_v4  ;;  %1296 = vmatprep.subr.bf16.mxu0 %v1295_v10  ;;  %v1306_v20 = vpack.c.bf16 %v24_v19, %v23_v18  ;;  %v26_v22 = vld [vmem:[%s1719_s2 + $0x60] sm:$0xff]  ;;  %v1177_v29 = vld [vmem:[%s1719_s2 + $0xc8] ss:$0 sm:$0xff]  ;;  %v214_v30 = vsub.s32 %v211_v27, %v1486_v28  ;;  %v1179_v45 = vld [vmem:[%s1719_s2 + $0xc9] ss:$0 sm:$0xff]  ;;  %vm560_vm8 = vcmask 654912  }
   0x7   :  { %v1310_v23 = vpack.c.bf16 %v26_v22, %v25_v21  ;;  %v1523_v22 = vand.u32 127, %v212_v26  ;;  %v1402_v26 = vmov 0   ;;  %vm669_vm9 = vcmask 720512   ;;  %s1405_s4 = smov 127  }
   0x8   :  { %1355 = vset.pattern.permute.xlu0 %v1402_v26  ;;  %1354 = vset.pattern.permute.xlu1 %v1402_v26  ;;  %vm818_vm10 = vcmask 130048   ;;  %vm778_vm11 = vcmask 786112   ;;  %vm1110_vm14 = vcmask 386048   ;;  %vm1167_vm15 = vcmask 523264  }
   0x9   :  { %1243 = vmatpush3.msra.mxu1 %v22_v14  ;;  %1298 = vmatpush3.bf16.msra.mxu0 %v1295_v10  ;;  %v1527_v24 = vsub.s32 %v1523_v22, %v1486_v28 }
   0xa   :  { %1245 = vmatmul.mubr.msk.f32.vlgmr.msra.gmra.mrb[0].mxu1 %vm134_vm2, %v129_v16  ;;  %1300 = vmatprep.subr.bf16.mxu0 %v1299_v15 }
   0xb   :  { %1307 = vmatprep.subr.bf16.mxu1 %v1306_v20 }
   0xc   :  { %1309 = vmatpush3.bf16.msra.mxu1 %v1306_v20 }
   0xd   :  { %1302 = vmatpush3.bf16.msra.mxu0 %v1299_v15  ;;  %1311 = vmatprep.subr.bf16.mxu1 %v1310_v23 }
   0xe   :  { %1314 = vmatprep.subr.bf16.mxu0 %v1394_v0 }
  0x10   :  { %1236 = vmatmul.mubr.msk.f32.vlgmr.msra.gmra.mrb[0].mxu0 %vm47_vm1, %v46_v17  ;;  %1313 = vmatpush3.bf16.msra.mxu1 %v1310_v23 }
  0x11   :  { %1266 = vmatprep.mubr.msk.f32.mxu0 %vm1395_vm0, %v1396_v4  ;;  %1320 = vmatprep.subr.bf16.mxu1 %v1394_v0 }
  0xdd   :  { %v204_v31 = vpop.f32.mrb[0].mxu1 }
  0xde   :  { %v205_v32 = vadd.f32 %v1177_v29, %v204_v31  ;;  %v1246_v33 = vpop.f32.mrb[1].mxu1 }
  0xe0   :  { %v215_v34 = vrot.slane %v205_v32, %v214_v30 }
  0xe2   :  { %v216_v36 = vcombine.high %v215_v34, %v215_v34  ;;  %v223_v37 = vrot.slane %v215_v34, %v214_v30 }
  0xe3   :  { %v1237_v38 = vpop.f32.mrb[0].mxu0 }
  0xe4   :  { %v230_v39 = vrot.slane %v216_v36, %v214_v30  ;;  %v120_v40 = vpop.f32.mrb[1].mxu0  ;;  %v234_v41 = vrot.slane %v223_v37, %v1493_v35 }
  0xe6   :  { %v238_v42 = vrot.slane %v230_v39, %v1493_v35  ;;  %v241_v43 = vadd.f32 %v234_v41, %v120_v40 }
  0xe8   :  { %v242_v44 = vadd.f32 %v1237_v38, %v238_v42  ;;  %1255 = vmatprep.mubr.msk.f32.mxu1 %vm247_vm3, %v241_v43 }
  0xea   :  { %1256 = vmatmul.mubr.msk.f32.vlgmr.msra.gmra.mrb[2].mxu1 %vm247_vm3, %v242_v44 }
  0xeb   :  { %1277 = vmatprep.mubr.msk.f32.mxu1 %vm1395_vm0, %v1396_v4 }
 0x1bd   :  { %v1257_v46 = vpop.f32.mrb[2].mxu1 }
 0x1be   :  { %v320_v47 = vpop.f32.mrb[3].mxu1  ;;  %v1507_v49 = vadd.f32 %v1257_v46, %v1179_v45 }
 0x1bf   :  { %v1504_v48 = vadd.f32 %v1179_v45, %v320_v47 }
 0x1c0   :  { %v336_v52 = vsel %vm247_vm3, %v1507_v49, 0.0 }
 0x1c1   :  { %348 = vrot.lane.b32.xlu0 %v1504_v48, %s1398_s19  ;;  %v329_v50 = vsel %vm247_vm3, %v1504_v48, 0.0  ;;  %v337_v54 = vrot.slane %v336_v52, 4 }
 0x1c2   :  { %v330_v51 = vrot.slane %v329_v50, 4 }
 0x1c3   :  { %v338_v56 = vadd.f32 %v337_v54, %v336_v52 }
 0x1c4   :  { %v331_v53 = vadd.f32 %v330_v51, %v329_v50 }
 0x1c5   :  { %350 = vrot.lane.b32.xlu0 %v1507_v49, %s1398_s19  ;;  %v339_v58 = vrot.slane %v338_v56, 2 }
 0x1c6   :  { %v332_v55 = vrot.slane %v331_v53, 2 }
 0x1c7   :  { %v340_v60 = vadd.f32 %v339_v58, %v338_v56 }
 0x1c8   :  { %v333_v57 = vadd.f32 %v332_v55, %v331_v53 }
 0x1c9   :  { %v341_v62 = vrot.slane %v340_v60, 1 }
 0x1ca   :  { %v334_v59 = vrot.slane %v333_v57, 1 }
 0x1cb   :  { %v342_v1 = vadd.f32 %v341_v62, %v340_v60 }
 0x1cc   :  { %v335_v61 = vadd.f32 %v334_v59, %v333_v57 }
 0x1cd   :  { %v345_v5 = vmul.f32 0.125, %v342_v1 }
 0x1ce   :  { %v344_v63 = vmul.f32 0.125, %v335_v61  ;;  %v1546_v61 = vsub.s32 1, %v1486_v28 }
 0x233   :  { %v349_v2 = vpop.permute.xlu0 %348 }
 0x234   :  { %v354_v3 = vmul.f32 %v349_v2, %v344_v63 }
 0x236   :  { %575 = vrot.lane.b32.xlu0 %v354_v3, %s1399_s20  ;;  %v357_v8 = vsel %vm356_vm4, %v354_v3, 0.0 }
 0x237   :  { %v351_v6 = vpop.permute.xlu0 %350 }
 0x238   :  { %v355_v7 = vmul.f32 %v351_v6, %v345_v5 }
 0x23a   :  { %468 = vrot.lane.b32.xlu1 %v355_v7, %s1400_s21  ;;  %684 = vrot.lane.b32.xlu0 %v354_v3, %s1401_s22  ;;  %v360_v9 = vsel %vm356_vm4, %v355_v7, 0.0 }
 0x23e   :  { %577 = vrot.lane.b32.xlu1 %v355_v7, %s1399_s20 }
 0x242   :  { %466 = vrot.lane.b32.xlu1 %v354_v3, %s1400_s21 }
 0x246   :  { %686 = vrot.lane.b32.xlu1 %v355_v7, %s1401_s22 }
 0x259   :  { %358 = vadd.xlane.f32.xlu0 %v357_v8 }
 0x26a   :  { %361 = vadd.xlane.f32.xlu1 %v360_v9 }
 0x2a8   :  { %v576_v10 = vpop.permute.xlu0 %575 }
 0x2a9   :  { %v581_v11 = vsel %vm356_vm4, %v576_v10, 0.0 }
 0x2aa   :  { %582 = vadd.xlane.f32.xlu1 %v581_v11 }
 0x2ac   :  { %v469_v12 = vpop.permute.xlu1 %468  ;;  %v685_v13 = vpop.permute.xlu0 %684 }
 0x2ad   :  { %v690_v14 = vsel %vm356_vm4, %v685_v13, 0.0  ;;  %v475_v15 = vsel %vm356_vm4, %v469_v12, 0.0 }
 0x2ae   :  { %691 = vadd.xlane.f32.xlu1 %v690_v14  ;;  %476 = vadd.xlane.f32.xlu0 %v475_v15 }
 0x2b0   :  { %v578_v16 = vpop.permute.xlu1 %577 }
 0x2b1   :  { %v584_v17 = vsel %vm356_vm4, %v578_v16, 0.0 }
 0x2b2   :  { %585 = vadd.xlane.f32.xlu0 %v584_v17 }
 0x2b4   :  { %v467_v18 = vpop.permute.xlu1 %466 }
 0x2b5   :  { %v472_v19 = vsel %vm356_vm4, %v467_v18, 0.0 }
 0x2b6   :  { %473 = vadd.xlane.f32.xlu0 %v472_v19 }
 0x2b8   :  { %v687_v20 = vpop.permute.xlu1 %686 }
 0x2b9   :  { %v693_v21 = vsel %vm356_vm4, %v687_v20, 0.0 }
 0x2ba   :  { %694 = vadd.xlane.f32.xlu0 %v693_v21 }
 0x2e6   :  { %v359_v23 = vpop.xlane.xlu0 %358 }
 0x2e7   :  { %v363_v25 = vmul.f32 0.35355338, %v359_v23 }
 0x2e9   :  { %v372_v30 = vrot.slane %v363_v25, %v1527_v24 }
 0x2f7   :  { %v362_v27 = vpop.xlane.xlu1 %361 }
 0x2f8   :  { %v364_v29 = vmul.f32 0.35355338, %v362_v27 }
 0x2fa   :  { %v376_v31 = vrot.slane %v364_v29, %v1527_v24 }
 0x2fc   :  { %v378_v32 = vsel %vm377_vm5, %v376_v31, %v372_v30 }
 0x2fd   :  { %v381_v33 = vsel %vm380_vm6, %v378_v32, -inf }
 0x2fe   :  { %382 = vmax.xlane.f32.xlu1 %v381_v33 }
 0x337   :  { %v583_v34 = vpop.xlane.xlu1 %582 }
 0x338   :  { %v587_v37 = vmul.f32 0.35355338, %v583_v34 }
 0x33a   :  { %v594_v40 = vrot.slane %v587_v37, %v1527_v24 }
 0x33b   :  { %v477_v36 = vpop.xlane.xlu0 %476  ;;  %v692_v43 = vpop.xlane.xlu1 %691 }
 0x33c   :  { %v479_v41 = vmul.f32 0.35355338, %v477_v36  ;;  %v696_v50 = vmul.f32 0.35355338, %v692_v43 }
 0x33e   :  { %v489_v51 = vrot.slane %v479_v41, %v1527_v24  ;;  %v703_v57 = vrot.slane %v696_v50, %v1527_v24 }
 0x33f   :  { %v586_v38 = vpop.xlane.xlu0 %585 }
 0x340   :  { %v588_v39 = vmul.f32 0.35355338, %v586_v38 }
 0x342   :  { %v598_v42 = vrot.slane %v588_v39, %v1527_v24 }
 0x343   :  { %v474_v44 = vpop.xlane.xlu0 %473 }
 0x344   :  { %v478_v45 = vmul.f32 0.35355338, %v474_v44  ;;  %v599_v46 = vsel %vm377_vm5, %v598_v42, %v594_v40 }
 0x345   :  { %v601_v47 = vsel %vm380_vm6, %v599_v46, -inf }
 0x346   :  { %v485_v52 = vrot.slane %v478_v45, %v1527_v24  ;;  %602 = vmax.xlane.f32.xlu1 %v601_v47 }
 0x347   :  { %v695_v53 = vpop.xlane.xlu0 %694 }
 0x348   :  { %v697_v54 = vmul.f32 0.35355338, %v695_v53  ;;  %v490_v55 = vsel %vm377_vm5, %v489_v51, %v485_v52 }
 0x349   :  { %v492_v56 = vsel %vm380_vm6, %v490_v55, -inf }
 0x34a   :  { %v707_v58 = vrot.slane %v697_v54, %v1527_v24  ;;  %493 = vmax.xlane.f32.xlu0 %v492_v56 }
 0x34c   :  { %v708_v59 = vsel %vm377_vm5, %v707_v58, %v703_v57 }
 0x34d   :  { %v710_v60 = vsel %vm380_vm6, %v708_v59, -inf }
 0x34e   :  { %711 = vmax.xlane.f32.xlu0 %v710_v60 }
 0x38b   :  { %v383_v62 = vpop.xlane.xlu1 %382 }
 0x38c   :  { %v388_v63 = vrot.slane %v383_v62, %v1493_v35  ;;  %v392_v1 = vrot.slane %v383_v62, %v1546_v61 }
 0x38e   :  { %v395_v2 = vsub.f32 %v363_v25, %v388_v63  ;;  %v396_v3 = vsub.f32 %v364_v29, %v392_v1 }
 0x390   :  { %v397_v5 = vmul.f32 1.442695, %v395_v2  ;;  %v399_v6 = vmul.f32 1.442695, %v396_v3 }
 0x392   :  { %1356 = vpow2.f32 %v397_v5 }
 0x393   :  { %1358 = vpow2.f32 %v399_v6 }
 0x39c   :  { %v1550_v7 = vpop.eup %1356 }
 0x39d   :  { %v1552_v8 = vpop.eup %1358  ;;  %404 = vperm.xlu1 %1354, %v1550_v7  }
 0x39e   :  { %407 = vperm.xlu0 %1355, %v1552_v8  }
 0x3d3   :  { %v603_v9 = vpop.xlane.xlu1 %602 }
 0x3d4   :  { %v608_v13 = vrot.slane %v603_v9, %v1493_v35  ;;  %v612_v17 = vrot.slane %v603_v9, %v1546_v61 }
 0x3d6   :  { %v615_v18 = vsub.f32 %v587_v37, %v608_v13  ;;  %v616_v21 = vsub.f32 %v588_v39, %v612_v17 }
 0x3d7   :  { %v494_v10 = vpop.xlane.xlu0 %493 }
 0x3d8   :  { %v499_v11 = vrot.slane %v494_v10, %v1493_v35  ;;  %v503_v12 = vrot.slane %v494_v10, %v1546_v61  ;;  %v617_v23 = vmul.f32 1.442695, %v615_v18  ;;  %v619_v27 = vmul.f32 1.442695, %v616_v21 }
 0x3da   :  { %v506_v14 = vsub.f32 %v478_v45, %v499_v11  ;;  %v507_v15 = vsub.f32 %v479_v41, %v503_v12 }
 0x3db   :  { %v712_v20 = vpop.xlane.xlu0 %711 }
 0x3dc   :  { %v508_v16 = vmul.f32 1.442695, %v506_v14  ;;  %v510_v19 = vmul.f32 1.442695, %v507_v15  ;;  %v717_v25 = vrot.slane %v712_v20, %v1493_v35  ;;  %v721_v29 = vrot.slane %v712_v20, %v1546_v61 }
 0x3de   :  { %1360 = vpow2.f32 %v508_v16  ;;  %v724_v30 = vsub.f32 %v696_v50, %v717_v25  ;;  %v725_v32 = vsub.f32 %v697_v54, %v721_v29 }
 0x3df   :  { %1362 = vpow2.f32 %v510_v19 }
 0x3e0   :  { %1364 = vpow2.f32 %v617_v23  ;;  %v726_v33 = vmul.f32 1.442695, %v724_v30  ;;  %v728_v34 = vmul.f32 1.442695, %v725_v32 }
 0x3e1   :  { %1366 = vpow2.f32 %v619_v27 }
 0x3e2   :  { %1368 = vpow2.f32 %v726_v33 }
 0x3e3   :  { %1370 = vpow2.f32 %v728_v34 }
 0x3e8   :  { %v1562_v31 = vpop.eup %1360 }
 0x3e9   :  { %515 = vperm.xlu1 %1354, %v1562_v31   ;;  %v1565_v26 = vpop.eup %1362 }
 0x3ea   :  { %v1568_v36 = vpop.eup %1364 }
 0x3eb   :  { %v1571_v37 = vpop.eup %1366 }
 0x3ec   :  { %v1574_v38 = vpop.eup %1368 }
 0x3ed   :  { %518 = vperm.xlu1 %1354, %v1565_v26   ;;  %v1577_v39 = vpop.eup %1370 }
 0x3f1   :  { %624 = vperm.xlu1 %1354, %v1568_v36  }
 0x3f5   :  { %627 = vperm.xlu1 %1354, %v1571_v37  }
 0x3f9   :  { %733 = vperm.xlu1 %1354, %v1574_v38  }
 0x3fd   :  { %736 = vperm.xlu1 %1354, %v1577_v39  }
 0x41c   :  { %v405_v40 = vpop.permute.xlu1 %404 }
 0x41d   :  { %v412_v41 = vrot.slane %v405_v40, %v1527_v24  ;;  %v408_v42 = vpop.permute.xlu0 %407 }
 0x41e   :  { %v416_v43 = vrot.slane %v408_v42, %v1527_v24 }
 0x420   :  { %v417_v44 = vsel %vm377_vm5, %v416_v43, %v412_v41 }
 0x421   :  { %v419_v45 = vsel %vm380_vm6, %v417_v44, 0.0 }
 0x422   :  { %420 = vadd.xlane.f32.xlu1 %v419_v45 }
 0x468   :  { %v516_v46 = vpop.permute.xlu1 %515 }
 0x469   :  { %v523_v50 = vrot.slane %v516_v46, %v1527_v24 }
 0x46c   :  { %v519_v47 = vpop.permute.xlu1 %518 }
 0x46d   :  { %v527_v51 = vrot.slane %v519_v47, %v1527_v24 }
 0x46f   :  { %v528_v52 = vsel %vm377_vm5, %v527_v51, %v523_v50 }
 0x470   :  { %v625_v53 = vpop.permute.xlu1 %624  ;;  %v530_v54 = vsel %vm380_vm6, %v528_v52, 0.0 }
 0x471   :  { %531 = vadd.xlane.f32.xlu0 %v530_v54  ;;  %v632_v56 = vrot.slane %v625_v53, %v1527_v24 }
 0x474   :  { %v628_v55 = vpop.permute.xlu1 %627 }
 0x475   :  { %v636_v57 = vrot.slane %v628_v55, %v1527_v24 }
 0x477   :  { %v637_v58 = vsel %vm377_vm5, %v636_v57, %v632_v56  ;;  %v831_v56 = vadd.s32 4294967288, %v1523_v22 }
 0x478   :  { %v734_v59 = vpop.permute.xlu1 %733  ;;  %v639_v60 = vsel %vm380_vm6, %v637_v58, 0.0 }
 0x479   :  { %640 = vadd.xlane.f32.xlu1 %v639_v60  ;;  %v741_v63 = vrot.slane %v734_v59, %v1527_v24  ;;  %v834_v58 = vsub.s32 %v831_v56, %v1486_v28  ;;  %v842_v60 = vadd.s32 4294967280, %v1523_v22 }
 0x47c   :  { %v737_v62 = vpop.permute.xlu1 %736 }
 0x47d   :  { %v745_v1 = vrot.slane %v737_v62, %v1527_v24 }
 0x47f   :  { %v746_v2 = vsel %vm377_vm5, %v745_v1, %v741_v63 }
 0x480   :  { %v748_v3 = vsel %vm380_vm6, %v746_v2, 0.0 }
 0x481   :  { %749 = vadd.xlane.f32.xlu0 %v748_v3 }
 0x4af   :  { %v421_v5 = vpop.xlane.xlu1 %420 }
 0x4b0   :  { %v426_v6 = vrot.slane %v421_v5, %v1493_v35  ;;  %v430_v9 = vrot.slane %v421_v5, %v1546_v61 }
 0x4b2   :  { %1372 = vrcp.f32 %v426_v6  ;;  %v845_v6 = vsub.s32 %v842_v60, %v1486_v28 }
 0x4b3   :  { %1374 = vrcp.f32 %v430_v9 }
 0x4bc   :  { %v1373_v10 = vpop.eup %1372 }
 0x4bd   :  { %v1375_v11 = vpop.eup %1374  ;;  %v434_v12 = vmul.f32 %v1373_v10, %v1550_v7 }
 0x4be   :  { %v436_v13 = vmul.f32 %v1375_v11, %v1552_v8 }
 0x4bf   :  { %439 = vperm.xlu1 %1354, %v434_v12  }
 0x4c0   :  { %444 = vperm.xlu0 %1355, %v436_v13  }
 0x4fe   :  { %v532_v14 = vpop.xlane.xlu0 %531 }
 0x4ff   :  { %v537_v15 = vrot.slane %v532_v14, %v1493_v35  ;;  %v541_v16 = vrot.slane %v532_v14, %v1546_v61 }
 0x501   :  { %1376 = vrcp.f32 %v537_v15  ;;  %v853_v15 = vadd.s32 4294967272, %v1523_v22 }
 0x502   :  { %1378 = vrcp.f32 %v541_v16 }
 0x503   :  { %v856_v22 = vsub.s32 %v853_v15, %v1486_v28 }
 0x506   :  { %v641_v17 = vpop.xlane.xlu1 %640 }
 0x507   :  { %v646_v18 = vrot.slane %v641_v17, %v1493_v35  ;;  %v650_v19 = vrot.slane %v641_v17, %v1546_v61 }
 0x509   :  { %1380 = vrcp.f32 %v646_v18 }
 0x50a   :  { %1382 = vrcp.f32 %v650_v19 }
 0x50b   :  { %v1377_v20 = vpop.eup %1376 }
 0x50c   :  { %v545_v7 = vmul.f32 %v1377_v20, %v1562_v31  ;;  %v1379_v8 = vpop.eup %1378 }
 0x50d   :  { %v547_v27 = vmul.f32 %v1379_v8, %v1565_v26 }
 0x50e   :  { %550 = vperm.xlu1 %1354, %v545_v7   ;;  %v750_v21 = vpop.xlane.xlu0 %749 }
 0x50f   :  { %v755_v23 = vrot.slane %v750_v21, %v1493_v35  ;;  %v759_v25 = vrot.slane %v750_v21, %v1546_v61 }
 0x511   :  { %1384 = vrcp.f32 %v755_v23 }
 0x512   :  { %1386 = vrcp.f32 %v759_v25  ;;  %555 = vperm.xlu1 %1354, %v547_v27  }
 0x513   :  { %v1381_v29 = vpop.eup %1380 }
 0x514   :  { %v1383_v30 = vpop.eup %1382  ;;  %v654_v32 = vmul.f32 %v1381_v29, %v1568_v36 }
 0x515   :  { %v656_v33 = vmul.f32 %v1383_v30, %v1571_v37 }
 0x516   :  { %659 = vperm.xlu0 %1355, %v654_v32  }
 0x517   :  { %664 = vperm.xlu1 %1354, %v656_v33  }
 0x51b   :  { %v1385_v31 = vpop.eup %1384 }
 0x51c   :  { %v1387_v34 = vpop.eup %1386  ;;  %v763_v40 = vmul.f32 %v1385_v31, %v1574_v38  ;;  %v27_v31 = vld [vmem:[%s1719_s2 + $0x68] sm:$0xff] }
 0x51d   :  { %v765_v35 = vmul.f32 %v1387_v34, %v1577_v39  ;;  %v28_v34 = vld [vmem:[%s1719_s2 + $0x70] sm:$0xff] }
 0x51e   :  { %768 = vperm.xlu0 %1355, %v763_v40   ;;  %v29_v40 = vld [vmem:[%s1719_s2 + $0x78] sm:$0xff] }
 0x51f   :  { %773 = vperm.xlu1 %1354, %v765_v35  }
 0x53e   :  { %v440_v61 = vpop.permute.xlu1 %439 }
 0x53f   :  { %v447_v26 = vmul.f32 %v440_v61, %v1504_v48  ;;  %v445_v41 = vpop.permute.xlu0 %444  ;;  %v824_v16 = vrot.slane %v440_v61, %v1527_v24 }
 0x540   :  { %v448_v42 = vmul.f32 %v445_v41, %v1507_v49  ;;  %v828_v17 = vrot.slane %v445_v41, %v1527_v24  ;;  %v30_v41 = vld [vmem:[%s1719_s2 + $0x80] sm:$0xff] }
 0x541   :  { %v450_v36 = vsel %vm449_vm7, %v447_v26, 0.0  ;;  %v1315_v26 = vpack.c.bf16 %v28_v34, %v27_v31 }
 0x542   :  { %v451_v43 = vrot.slane %v450_v36, 4  ;;  %v457_v37 = vsel %vm449_vm7, %v448_v42, 0.0  ;;  %v829_v32 = vsel %vm377_vm5, %v828_v17, %v824_v16 }
 0x543   :  { %v458_v44 = vrot.slane %v457_v37, 4  ;;  %1316 = vmatpush3.bf16.msra.mxu0 %v1315_v26 }
 0x544   :  { %v452_v45 = vadd.f32 %v451_v43, %v450_v36  ;;  %1317 = vmatprep.subr.bf16.mxu0 %v1394_v0 }
 0x545   :  { %v459_v46 = vadd.f32 %v458_v44, %v457_v37 }
 0x546   :  { %v453_v47 = vrot.slane %v452_v45, 2 }
 0x547   :  { %v460_v50 = vrot.slane %v459_v46, 2 }
 0x548   :  { %v454_v38 = vadd.f32 %v453_v47, %v452_v45 }
 0x549   :  { %v461_v51 = vadd.f32 %v460_v50, %v459_v46  ;;  %v1318_v46 = vpack.c.bf16 %v30_v41, %v29_v40  ;;  %v35_v41 = vld [vmem:[%s1719_s2 + $0xa8] sm:$0xff] }
 0x54a   :  { %v455_v39 = vrot.slane %v454_v38, 1 }
 0x54b   :  { %v462_v52 = vrot.slane %v461_v51, 1  ;;  %1319 = vmatpush3.bf16.msra.mxu0 %v1318_v46 }
 0x54c   :  { %v456_v53 = vadd.f32 %v455_v39, %v454_v38  ;;  %1326 = vmatprep.subr.bf16.mxu0 %v1394_v0 }
 0x54d   :  { %v463_v54 = vadd.f32 %v462_v52, %v461_v51 }
 0x54f   :  { %v795_v55 = vsel %vm377_vm5, %v463_v54, %v456_v53 }
 0x550   :  { %796 = vrot.lane.b32.xlu0 %v795_v55, %s1403_s23 }
 0x58d   :  { %v551_v57 = vpop.permute.xlu1 %550 }
 0x58e   :  { %v558_v59 = vmul.f32 %v551_v57, %v1504_v48  ;;  %v835_v2 = vrot.slane %v551_v57, %v834_v58 }
 0x590   :  { %v561_v62 = vsel %vm560_vm8, %v558_v59, 0.0 }
 0x591   :  { %v562_v63 = vrot.slane %v561_v62, 4  ;;  %v556_v1 = vpop.permute.xlu1 %555 }
 0x592   :  { %v559_v3 = vmul.f32 %v556_v1, %v1507_v49  ;;  %v839_v5 = vrot.slane %v556_v1, %v834_v58 }
 0x593   :  { %v563_v9 = vadd.f32 %v562_v63, %v561_v62 }
 0x594   :  { %v568_v10 = vsel %vm560_vm8, %v559_v3, 0.0  ;;  %v840_v11 = vsel %vm377_vm5, %v839_v5, %v835_v2 }
 0x595   :  { %v564_v12 = vrot.slane %v563_v9, 2  ;;  %v569_v13 = vrot.slane %v568_v10, 4  ;;  %v660_v14 = vpop.permute.xlu0 %659  ;;  %v864_v42 = vsel %vm356_vm4, %v829_v32, %v840_v11 }
 0x596   :  { %v665_v18 = vpop.permute.xlu1 %664  ;;  %v667_v19 = vmul.f32 %v660_v14, %v1504_v48  ;;  %v846_v20 = vrot.slane %v660_v14, %v845_v6 }
 0x597   :  { %v565_v7 = vadd.f32 %v564_v12, %v563_v9  ;;  %v570_v8 = vadd.f32 %v569_v13, %v568_v10  ;;  %v668_v21 = vmul.f32 %v665_v18, %v1507_v49  ;;  %v850_v23 = vrot.slane %v665_v18, %v845_v6 }
 0x598   :  { %v670_v25 = vsel %vm669_vm9, %v667_v19, 0.0 }
 0x599   :  { %v571_v27 = vrot.slane %v570_v8, 2  ;;  %v677_v29 = vsel %vm669_vm9, %v668_v21, 0.0  ;;  %v671_v30 = vrot.slane %v670_v25, 4  ;;  %v566_v24 = vrot.slane %v565_v7, 1 }
 0x59a   :  { %v678_v33 = vrot.slane %v677_v29, 4  ;;  %v851_v35 = vsel %vm377_vm5, %v850_v23, %v846_v20 }
 0x59b   :  { %v572_v61 = vadd.f32 %v571_v27, %v570_v8  ;;  %v672_v28 = vadd.f32 %v671_v30, %v670_v25  ;;  %v865_v43 = vsel %vm818_vm10, %v864_v42, %v851_v35  ;;  %v567_v39 = vadd.f32 %v566_v24, %v565_v7  ;;  %v31_v27 = vld [vmem:[%s1719_s2 + $0x88] sm:$0xff]  ;;  %v36_v42 = vld [vmem:[%s1719_s2 + $0xb0] sm:$0xff] }
 0x59c   :  { %v679_v36 = vadd.f32 %v678_v33, %v677_v29  ;;  %v32_v29 = vld [vmem:[%s1719_s2 + $0x90] sm:$0xff]  ;;  %v1182_v33 = vld [vmem:[%s1719_s2 + $0xca] ss:$0 sm:$0xff] }
 0x59d   :  { %v673_v37 = vrot.slane %v672_v28, 2  ;;  %v769_v44 = vpop.permute.xlu0 %768  ;;  %v573_v45 = vrot.slane %v572_v61, 1  ;;  %v1321_v30 = vpack.c.bf16 %v32_v29, %v31_v27 }
 0x59e   :  { %v680_v47 = vrot.slane %v679_v36, 2  ;;  %v774_v50 = vpop.permute.xlu1 %773  ;;  %v776_v38 = vmul.f32 %v769_v44, %v1504_v48  ;;  %v857_v51 = vrot.slane %v769_v44, %v856_v22 }
 0x59f   :  { %v674_v52 = vadd.f32 %v673_v37, %v672_v28  ;;  %v777_v53 = vmul.f32 %v774_v50, %v1507_v49  ;;  %v861_v54 = vrot.slane %v774_v50, %v856_v22  ;;  %v574_v55 = vadd.f32 %v573_v45, %v572_v61  ;;  %1322 = vmatpush3.bf16.msra.mxu1 %v1321_v30  ;;  %v33_v22 = vld [vmem:[%s1719_s2 + $0x98] sm:$0xff]  ;;  %v38_v37 = vld [vmem:[%s1719_s2 + $0xc0] sm:$0xff]  ;;  %v1185_v45 = vld [vmem:[%s1719_s2 + $0xcb] ss:$0 sm:$0xff] }
 0x5a0   :  { %v681_v56 = vadd.f32 %v680_v47, %v679_v36  ;;  %v779_v57 = vsel %vm778_vm11, %v776_v38, 0.0  ;;  %1323 = vmatprep.subr.bf16.mxu1 %v1394_v0  ;;  %v1327_v36 = vpack.c.bf16 %v36_v42, %v35_v41 }
 0x5a1   :  { %v786_v58 = vsel %vm778_vm11, %v777_v53, 0.0  ;;  %v780_v59 = vrot.slane %v779_v57, 4  ;;  %v801_v60 = vsel %vm377_vm5, %v574_v55, %v567_v39  ;;  %v675_v62 = vrot.slane %v674_v52, 1  ;;  %v1188_v53 = vld [vmem:[%s1719_s2 + $0xcc] ss:$0 sm:$0xff] }
 0x5a2   :  { %v787_v48 = vrot.slane %v786_v58, 4  ;;  %802 = vrot.lane.b32.xlu1 %v801_v60, %s1403_s23  ;;  %v682_v63 = vrot.slane %v681_v56, 1  ;;  %v862_v49 = vsel %vm377_vm5, %v861_v54, %v857_v51 }
 0x5a3   :  { %v781_v1 = vadd.f32 %v780_v59, %v779_v57  ;;  %v676_v2 = vadd.f32 %v675_v62, %v674_v52  ;;  %v1655_v3 = vsel %vm134_vm2, %v865_v43, %v862_v49  ;;  %v37_v43 = vld [vmem:[%s1719_s2 + $0xb8] sm:$0xff] }
 0x5a4   :  { %v788_v5 = vadd.f32 %v787_v48, %v786_v58  ;;  %v683_v6 = vadd.f32 %v682_v63, %v681_v56  ;;  %v1330_v44 = vpack.c.bf16 %v38_v37, %v37_v43 }
 0x5a5   :  { %v782_v9 = vrot.slane %v781_v1, 2 }
 0x5a6   :  { %v789_v10 = vrot.slane %v788_v5, 2  ;;  %v807_v11 = vsel %vm377_vm5, %v683_v6, %v676_v2 }
 0x5a7   :  { %v783_v12 = vadd.f32 %v782_v9, %v781_v1  ;;  %808 = vrot.lane.b32.xlu0 %v807_v11, %s1403_s23  ;;  %v44_v9 = vld [vmem:[%s1719_s2 + $0xcd] sm:$0x1] }
 0x5a8   :  { %v790_v13 = vadd.f32 %v789_v10, %v788_v5 }
 0x5a9   :  { %v784_v14 = vrot.slane %v783_v12, 1 }
 0x5aa   :  { %v791_v15 = vrot.slane %v790_v13, 1 }
 0x5ab   :  { %v785_v16 = vadd.f32 %v784_v14, %v783_v12 }
 0x5ac   :  { %v792_v17 = vadd.f32 %v791_v15, %v790_v13 }
 0x5ae   :  { %v813_v18 = vsel %vm377_vm5, %v792_v17, %v785_v16 }
 0x5af   :  { %814 = vrot.lane.b32.xlu1 %v813_v18, %s1403_s23 }
 0x5c2   :  { %v797_v19 = vpop.permute.xlu0 %796 }
 0x614   :  { %v803_v20 = vpop.permute.xlu1 %802 }
 0x615   :  { %v817_v8 = vsel %vm356_vm4, %v797_v19, %v803_v20 }
 0x619   :  { %v809_v7 = vpop.permute.xlu0 %808 }
 0x61a   :  { %v819_v21 = vsel %vm818_vm10, %v817_v8, %v809_v7 }
 0x621   :  { %v815_v23 = vpop.permute.xlu1 %814 }
 0x622   :  { %v1664_v25 = vsel %vm134_vm2, %v819_v21, %v815_v23 }
 0x623   :  { %1267 = vmatmul.mubr.msk.f32.vlgmr.msra.gmra.mrb[2].mxu0 %vm247_vm3, %v1664_v25 }
 0x624   :  { %1288 = vmatprep.mubr.msk.f32.mxu0 %vm1395_vm0, %v1396_v4  ;;  %v34_v4 = vld [vmem:[%s1719_s2 + $0xa0] sm:$0xff]  ;;  %1328 = vmatpush3.bf16.msra.mxu0 %v1327_v36  ;;  %vm1169_vm0 = vcmask 910336  }
 0x625   :  { %v1324_v32 = vpack.c.bf16 %v34_v4, %v33_v22  ;;  %1329 = vmatprep.subr.bf16.mxu0 %v1394_v0 }
 0x627   :  { %1325 = vmatpush3.bf16.msra.mxu1 %v1324_v32 }
 0x628   :  { %1331 = vmatpush3.bf16.msra.mxu0 %v1330_v44 }
 0x6f6   :  { %v940_v24 = vpop.f32.mrb[2].mxu0 }
 0x6f7   :  { %v941_v31 = vadd.f32 %v1182_v33, %v940_v24  ;;  %v1268_v34 = vpop.f32.mrb[3].mxu0 }
 0x6f9   :  { %v945_v40 = vmin.f32 %v941_v31, 0.0  ;;  %vm944_vm12 = vcmp.gt.f32.partialorder %v941_v31, 0.0 }
 0x6fb   :  { %v946_v35 = vmul.f32 1.442695, %v945_v40 }
 0x6fd   :  { %1388 = vpow2.f32 %v946_v35 }
 0x707   :  { %v1389_v61 = vpop.eup %1388 }
 0x708   :  { %v1184_v28 = vadd.f32 -1.0, %v1389_v61 }
 0x70a   :  { %v949_v26 = vsel %vm944_vm12, %v941_v31, %v1184_v28 }
 0x70b   :  { %1278 = vmatmul.mubr.msk.f32.vlgmr.msra.gmra.mrb[4].mxu1 %vm247_vm3, %v949_v26 }
 0x7de   :  { %v1023_v46 = vpop.f32.mrb[4].mxu1 }
 0x7df   :  { %v1024_v47 = vadd.f32 %v1185_v45, %v1023_v46  ;;  %v1279_v50 = vpop.f32.mrb[5].mxu1 }
 0x7e1   :  { %v1028_v38 = vmin.f32 %v1024_v47, 0.0  ;;  %vm1027_vm13 = vcmp.gt.f32.partialorder %v1024_v47, 0.0 }
 0x7e3   :  { %v1029_v51 = vmul.f32 1.442695, %v1028_v38 }
 0x7e5   :  { %1390 = vpow2.f32 %v1029_v51 }
 0x7ef   :  { %v1391_v0 = vpop.eup %1390 }
 0x7f0   :  { %v1187_v39 = vadd.f32 -1.0, %v1391_v0 }
 0x7f2   :  { %v1032_v52 = vsel %vm1027_vm13, %v1024_v47, %v1187_v39 }
 0x7f3   :  { %1289 = vmatmul.mubr.msk.f32.vlgmr.msra.gmra.mrb[4].mxu0 %vm247_vm3, %v1032_v52 }
 0x8c6   :  { %v1106_v54 = vpop.f32.mrb[4].mxu0 }
 0x8c7   :  { %v1107_v55 = vadd.f32 %v1188_v53, %v1106_v54  ;;  %v1290_v56 = vpop.f32.mrb[5].mxu0 }
 0x8c9   :  { %v1111_v57 = vsel %vm1110_vm14, %v1107_v55, 0.0 }
 0x8ca   :  { %1112 = vadd.xlane.f32.xlu0 %v1111_v57 }
 0x8e0   :  { %1152 = vrot.lane.b32.xlu0 %v44_v9, %s1405_s4 }
 0x957   :  { %v1113_v58 = vpop.xlane.xlu0 %1112 }
 0x958   :  { %v1114_v59 = vrot.slane %v1113_v58, 4 }
 0x95a   :  { %v1115_v60 = vadd.f32 %v1114_v59, %v1113_v58 }
 0x95b   :  { %v1153_v20 = vpop.permute.xlu0 %1152 }
 0x95c   :  { %v1116_v62 = vrot.slane %v1115_v60, 2 }
 0x95e   :  { %v1117_v48 = vadd.f32 %v1116_v62, %v1115_v60 }
 0x960   :  { %v1118_v63 = vrot.slane %v1117_v48, 1 }
 0x962   :  { %v1119_v49 = vadd.f32 %v1118_v63, %v1117_v48 }
 0x964   :  { %1332 = vpush %v1119_v49 }
 0x995   :  { %s1333_s26 = spop %1332 }
 0x996   :  { %s1123_s27 = smul.f32 0.010416667, %s1333_s26 }
 0x998   :  { %v1124_v1 = vstv %s1123_s27 }
 0x999   :  { %v1125_v2 = vsub.f32 %v1107_v55, %v1124_v1 }
 0x99b   :  { %v1126_v5 = vmul.f32 %v1125_v2, %v1125_v2 }
 0x99d   :  { %v1127_v6 = vsel %vm1110_vm14, %v1126_v5, 0.0 }
 0x99e   :  { %1128 = vadd.xlane.f32.xlu1 %v1127_v6 }
 0x9af   :  { %1159 = vrot.lane.b32.xlu1 %v1655_v3, %s1404_s28 }
 0xa2b   :  { %v1129_v10 = vpop.xlane.xlu1 %1128 }
 0xa2c   :  { %v1130_v11 = vrot.slane %v1129_v10, 4 }
 0xa2e   :  { %v1131_v12 = vadd.f32 %v1130_v11, %v1129_v10 }
 0xa2f   :  { %v1160_v27 = vpop.permute.xlu1 %1159 }
 0xa30   :  { %v1132_v13 = vrot.slane %v1131_v12, 2  ;;  %v1166_v29 = vsel %vm247_vm3, %v1664_v25, %v1160_v27 }
 0xa32   :  { %v1133_v14 = vadd.f32 %v1132_v13, %v1131_v12 }
 0xa34   :  { %v1134_v15 = vrot.slane %v1133_v14, 1 }
 0xa36   :  { %v1135_v16 = vadd.f32 %v1134_v15, %v1133_v14 }
 0xa38   :  { %1334 = vpush %v1135_v16 }
 0xa69   :  { %s1335_s5 = spop %1334 }
 0xa6a   :  { %s1139_s6 = smul.f32 0.010416667, %s1335_s5 }
 0xa6c   :  { %s1140_s7 = sadd.f32 0.001, %s1139_s6 }
 0xa6e   :  { %v1141_v17 = vstv %s1140_s7 }
 0xa6f   :  { %1392 = vrsqrt.f32 %v1141_v17 }
 0xa79   :  { %v1393_v3 = vpop.eup %1392 }
 0xa7a   :  { %1336 = vpush %v1393_v3 }
 0xaab   :  { %s1337_s8 = spop %1336 }
 0xaac   :  { %v1144_v18 = vstv %s1337_s8 }
 0xaad   :  { %v1145_v19 = vmul.f32 %v1144_v18, %v44_v9 }
 0xaaf   :  { %1338 = vpush %v1145_v19 }
 0xab0   :  { %1340 = vpush %v1153_v20 }
 0xae0   :  { %s1339_s2 = spop %1338 }
 0xae1   :  { %v1148_v7 = vstv %s1339_s2  ;;  %s1341_s1 = spop %1340 }
 0xae2   :  { %v1150_v8 = vmul.f32 %v1148_v7, %v1125_v2  ;;  %v1155_v21 = vstv %s1341_s1 }
 0xae4   :  { %v1157_v23 = vadd.f32 %v1155_v21, %v1150_v8 }
 0xae6   :  { %1163 = vrot.lane.b32.xlu0 %v1157_v23, %s1403_s23 }
 0xb58   :  { %v1164_v30 = vpop.permute.xlu0 %1163 }
 0xb59   :  { %v1168_v22 = vsel %vm1167_vm15, %v1166_v29, %v1164_v30 }
 0xb5a   :  { %1170 = vst.msk [vmem:[%s1722_s3] sm:$0x3] %vm1169_vm0, %v1168_v22 }

</bundles_post_ra>
